<compile_context>
chip_gen: v7x
topology: tpu7x:2x2x1
jax: 0.10.0
libtpu: 0.0.40
codegen_flags: <defaults>
</compile_context>

<pallas_src>
import functools
import jax
import jax.numpy as jnp
from jax.experimental import pallas as pl
from jax.experimental.pallas import tpu as pltpu


def _attention_kernel(x_ref, gamma_ref, beta_ref, wq_ref, wk_ref, wv_ref,
                      wout_ref, bout_ref, o_ref, *, heads, dim_head):
    # One grid step == one batch element; the whole (N, D) tile lives in VMEM.
    N, D = x_ref.shape[1], x_ref.shape[2]

    # ---- LayerNorm over last dim, f32 (eps matches torch default 1e-5) ----
    x = x_ref[0].astype(jnp.float32)                 # (N, D)
    gamma = gamma_ref[...].astype(jnp.float32)       # (1, D)
    beta = beta_ref[...].astype(jnp.float32)         # (1, D)
    mean = jnp.mean(x, axis=-1, keepdims=True)
    xc = x - mean
    var = jnp.mean(xc * xc, axis=-1, keepdims=True)
    xn = xc * jax.lax.rsqrt(var + 1e-5) * gamma + beta            # (N, D) f32

    # MXU operand dtype follows the parameters (bf16 params -> bf16 MXU, f32 -> f32).
    cdt = wq_ref.dtype
    # Hoisted once: replicate normalized rows across the head batch dim.
    xb = jnp.broadcast_to(xn.astype(cdt)[None], (heads, N, D))    # (H, N, D)

    # ---- QKV projection as head-batched matmuls (softmax scale pre-folded into W_q) ----
    q = jnp.einsum('hnd,hdk->hnk', xb, wq_ref[...],
                   preferred_element_type=jnp.float32)            # (H, N, Dh)
    k = jnp.einsum('hnd,hdk->hnk', xb, wk_ref[...],
                   preferred_element_type=jnp.float32)            # (H, N, Dh)
    v = jnp.einsum('hnd,hdk->hnk', xb, wv_ref[...],
                   preferred_element_type=jnp.float32)            # (H, N, Dh)

    # ---- Scaled dot-product attention, batched over heads ----
    # Scores: contract last dims of q and k directly (no explicit transpose).
    dots = jnp.einsum('hnk,hmk->hnm', q.astype(cdt), k.astype(cdt),
                      preferred_element_type=jnp.float32)         # (H, N, N)
    m = jnp.max(dots, axis=-1, keepdims=True)
    e = jnp.exp(dots - m)                                         # EUP
    denom = jnp.sum(e, axis=-1, keepdims=True)                    # (H, N, 1)
    # attn @ V with the normalization applied after the matmul (EUP reciprocal).
    out_h = jnp.einsum('hnm,hmk->hnk', e.astype(cdt), v.astype(cdt),
                       preferred_element_type=jnp.float32)        # (H, N, Dh)
    out_h = out_h * pl.reciprocal(denom, approx=True)             # softmax normalize
    # (dropout p=0.0 -> identity)

    # ---- Output projection: per-head matmul, then reduce over heads (== concat @ W_out) ----
    y_h = jnp.einsum('hnk,hkd->hnd', out_h.astype(cdt), wout_ref[...],
                     preferred_element_type=jnp.float32)          # (H, N, D)
    y = jnp.sum(y_h, axis=0) + bout_ref[...].astype(jnp.float32)  # (N, D)

    o_ref[0] = y.astype(o_ref.dtype)


@functools.partial(jax.jit, static_argnames=("heads", "dim_head"))
def attention_forward(x, gamma, beta, w_qkv, w_out, b_out, *, heads, dim_head):
    """x: (B, N, D); w_qkv: (D, 3*H*Dh); w_out: (H*Dh, D)."""
    B, N, D = x.shape
    scale = float(dim_head) ** -0.5

    # One-time, wrapper-side weight re-arrangement (outside the kernel):
    #  * split fused QKV -> per-head (H, D, Dh) so the kernel never lane-slices at
    #    non-128-aligned offsets and never reshapes/transposes heads,
    #  * fold the softmax scale into W_q,
    #  * reshape W_out to (H, Dh, D) so the out-projection is a batched per-head
    #    matmul + head reduction (replaces concat + transpose).
    w_q, w_k, w_v = jnp.split(w_qkv, 3, axis=-1)                        # (D, H*Dh) each

    def per_head(w):
        return w.reshape(D, heads, dim_head).transpose(1, 0, 2)         # (H, D, Dh)

    w_q_h = per_head(w_q) * jnp.asarray(scale, w_qkv.dtype)
    w_k_h = per_head(w_k)
    w_v_h = per_head(w_v)
    w_out_h = w_out.reshape(heads, dim_head, D)                          # (H, Dh, D)

    kernel = functools.partial(_attention_kernel, heads=heads, dim_head=dim_head)

    return pl.pallas_call(
        kernel,
        out_shape=jax.ShapeDtypeStruct((B, N, D), x.dtype),
        grid_spec=pltpu.PrefetchScalarGridSpec(
            num_scalar_prefetch=0,
            grid=(B,),
            in_specs=[
                pl.BlockSpec((1, N, D), lambda b: (b, 0, 0)),            # x
                pl.BlockSpec((1, D), lambda b: (0, 0)),                  # gamma
                pl.BlockSpec((1, D), lambda b: (0, 0)),                  # beta
                pl.BlockSpec((heads, D, dim_head), lambda b: (0, 0, 0)), # W_q (pre-scaled)
                pl.BlockSpec((heads, D, dim_head), lambda b: (0, 0, 0)), # W_k
                pl.BlockSpec((heads, D, dim_head), lambda b: (0, 0, 0)), # W_v
                pl.BlockSpec((heads, dim_head, D), lambda b: (0, 0, 0)), # W_out
                pl.BlockSpec((1, D), lambda b: (0, 0)),                  # b_out
            ],
            out_specs=pl.BlockSpec((1, N, D), lambda b: (b, 0, 0)),
        ),
        compiler_params=pltpu.CompilerParams(
            dimension_semantics=("parallel",)),
    )(x, gamma.reshape(1, D), beta.reshape(1, D),
      w_q_h, w_k_h, w_v_h, w_out_h, b_out.reshape(1, D))


if __name__ == "__main__":
    # Small shapes consistent with the module: dim=32, heads=4, dim_head=16
    B, N, D = 2, 8, 32
    heads, dim_head = 4, 16
    inner = heads * dim_head

    key = jax.random.PRNGKey(0)
    kx, kqkv, kwo, kbo = jax.random.split(key, 4)

    x = jax.random.normal(kx, (B, N, D), dtype=jnp.float32)

    # Deterministic parameter init (LayerNorm: ones/zeros; Linears: small normals)
    gamma = jnp.ones((D,), dtype=jnp.float32)
    beta = jnp.zeros((D,), dtype=jnp.float32)
    w_qkv = jax.random.normal(kqkv, (D, 3 * inner), dtype=jnp.float32) * 0.02
    w_out = jax.random.normal(kwo, (inner, D), dtype=jnp.float32) * 0.02
    b_out = jax.random.normal(kbo, (D,), dtype=jnp.float32) * 0.02

    y = attention_forward(x, gamma, beta, w_qkv, w_out, b_out,
                          heads=heads, dim_head=dim_head)
    y = jax.block_until_ready(y)

    # Pure-JAX reference for sanity check
    def ref(x):
        mean = jnp.mean(x, -1, keepdims=True)
        var = jnp.mean((x - mean) ** 2, -1, keepdims=True)
        xn = (x - mean) / jnp.sqrt(var + 1e-5) * gamma + beta
        qkv = xn @ w_qkv
        q, k, v = jnp.split(qkv, 3, axis=-1)

        def heads_split(t):
            return t.reshape(B, N, heads, dim_head).transpose(0, 2, 1, 3)

        q, k, v = map(heads_split, (q, k, v))
        dots = jnp.einsum("bhnd,bhmd->bhnm", q, k) * (dim_head ** -0.5)
        attn = jax.nn.softmax(dots, axis=-1)
        o = jnp.einsum("bhnm,bhmd->bhnd", attn, v)
        o = o.transpose(0, 2, 1, 3).reshape(B, N, inner)
        return o @ w_out + b_out

    # Tolerance relaxed slightly vs. exact math because the softmax denominator uses
    # the EUP approximate reciprocal; structural errors would be orders larger.
    assert jnp.allclose(y, ref(x), atol=2e-3, rtol=2e-3), "mismatch vs reference"
    print("KERNEL_OK")
</pallas_src>

<mosaic_0001>
module attributes {stable_mosaic.version = 11 : i64} {
  func.func @_attention_kernel(%arg0: i32, %arg1: memref<1x8x32xf32, #tpu.memory_space<vmem>>, %arg2: memref<1x32xf32, #tpu.memory_space<vmem>>, %arg3: memref<1x32xf32, #tpu.memory_space<vmem>>, %arg4: memref<4x32x16xf32, #tpu.memory_space<vmem>>, %arg5: memref<4x32x16xf32, #tpu.memory_space<vmem>>, %arg6: memref<4x32x16xf32, #tpu.memory_space<vmem>>, %arg7: memref<4x16x32xf32, #tpu.memory_space<vmem>>, %arg8: memref<1x32xf32, #tpu.memory_space<vmem>>, %arg9: memref<1x8x32xf32, #tpu.memory_space<vmem>>) attributes {dimension_semantics = [#tpu.dimension_semantics<parallel>], iteration_bounds = array<i64: 2>, scalar_prefetch = 0 : i64, scratch_operands = 0 : i64, tpu.core_type = #tpu.core_type<tc>, window_params = [{transform_indices = @transform_0, window_bounds = array<i64: 1, 8, 32>}, {pipeline_mode = #tpu.pipeline_mode<synchronous>, transform_indices = @transform_1, window_bounds = array<i64: 1, 32>}, {pipeline_mode = #tpu.pipeline_mode<synchronous>, transform_indices = @transform_2, window_bounds = array<i64: 1, 32>}, {pipeline_mode = #tpu.pipeline_mode<synchronous>, transform_indices = @transform_3, window_bounds = array<i64: 4, 32, 16>}, {pipeline_mode = #tpu.pipeline_mode<synchronous>, transform_indices = @transform_4, window_bounds = array<i64: 4, 32, 16>}, {pipeline_mode = #tpu.pipeline_mode<synchronous>, transform_indices = @transform_5, window_bounds = array<i64: 4, 32, 16>}, {pipeline_mode = #tpu.pipeline_mode<synchronous>, transform_indices = @transform_6, window_bounds = array<i64: 4, 16, 32>}, {pipeline_mode = #tpu.pipeline_mode<synchronous>, transform_indices = @transform_7, window_bounds = array<i64: 1, 32>}, {transform_indices = @transform_8, window_bounds = array<i64: 1, 8, 32>}]} {
    %c0 = arith.constant 0 : index
    %c0_0 = arith.constant 0 : index
    %c0_1 = arith.constant 0 : index
    %0 = vector.load %arg1[%c0, %c0_0, %c0_1] : memref<1x8x32xf32, #tpu.memory_space<vmem>>, vector<1x8x32xf32>
    %1 = vector.shape_cast %0 : vector<1x8x32xf32> to vector<8x32xf32>
    %c0_2 = arith.constant 0 : index
    %c0_3 = arith.constant 0 : index
    %2 = vector.load %arg2[%c0_2, %c0_3] : memref<1x32xf32, #tpu.memory_space<vmem>>, vector<1x32xf32>
    %c0_4 = arith.constant 0 : index
    %c0_5 = arith.constant 0 : index
    %3 = vector.load %arg3[%c0_4, %c0_5] : memref<1x32xf32, #tpu.memory_space<vmem>>, vector<1x32xf32>
    %cst = arith.constant dense<0.000000e+00> : vector<8xf32>
    %4 = vector.multi_reduction <add>, %1, %cst [1] : vector<8x32xf32> to vector<8xf32>
    %5 = vector.shape_cast %4 : vector<8xf32> to vector<8x1xf32>
    %cst_6 = arith.constant 3.200000e+01 : f32
    %6 = vector.broadcast %cst_6 : f32 to vector<8x1xf32>
    %7 = arith.divf %5, %6 : vector<8x1xf32>
    %8 = vector.broadcast %7 : vector<8x1xf32> to vector<8x32xf32>
    %9 = arith.subf %1, %8 : vector<8x32xf32>
    %10 = arith.mulf %9, %9 : vector<8x32xf32>
    %cst_7 = arith.constant dense<0.000000e+00> : vector<8xf32>
    %11 = vector.multi_reduction <add>, %10, %cst_7 [1] : vector<8x32xf32> to vector<8xf32>
    %12 = vector.shape_cast %11 : vector<8xf32> to vector<8x1xf32>
    %cst_8 = arith.constant 3.200000e+01 : f32
    %13 = vector.broadcast %cst_8 : f32 to vector<8x1xf32>
    %14 = arith.divf %12, %13 : vector<8x1xf32>
    %cst_9 = arith.constant 9.99999974E-6 : f32
    %15 = vector.broadcast %cst_9 : f32 to vector<8x1xf32>
    %16 = arith.addf %14, %15 : vector<8x1xf32>
    %17 = math.rsqrt %16 : vector<8x1xf32>
    %18 = vector.broadcast %17 : vector<8x1xf32> to vector<8x32xf32>
    %19 = arith.mulf %9, %18 : vector<8x32xf32>
    %20 = vector.broadcast %2 : vector<1x32xf32> to vector<8x32xf32>
    %21 = arith.mulf %19, %20 : vector<8x32xf32>
    %22 = vector.broadcast %3 : vector<1x32xf32> to vector<8x32xf32>
    %23 = arith.addf %21, %22 : vector<8x32xf32>
    %24 = vector.shape_cast %23 : vector<8x32xf32> to vector<1x8x32xf32>
    %25 = vector.shape_cast %24 : vector<1x8x32xf32> to vector<1x8x32xf32>
    %26 = vector.broadcast %25 : vector<1x8x32xf32> to vector<4x8x32xf32>
    %c0_10 = arith.constant 0 : index
    %c0_11 = arith.constant 0 : index
    %c0_12 = arith.constant 0 : index
    %27 = vector.load %arg4[%c0_10, %c0_11, %c0_12] : memref<4x32x16xf32, #tpu.memory_space<vmem>>, vector<4x32x16xf32>
    "tpu.trace_start"() <{level = 10 : i32, message = "hnd,hdk->hnk"}> : () -> ()
    %cst_13 = arith.constant dense<0.000000e+00> : vector<4x8x16xf32>
    %28 = tpu.matmul %26, %27, %cst_13 {dimension_numbers = #tpu.dot_dimension_numbers<[2], [1], [1], [2], [0, 0, 0, 1, 1, 2], [0], [0]>} : vector<4x8x32xf32>, vector<4x32x16xf32>, vector<4x8x16xf32> -> vector<4x8x16xf32>
    "tpu.trace_stop"() : () -> ()
    %c0_14 = arith.constant 0 : index
    %c0_15 = arith.constant 0 : index
    %c0_16 = arith.constant 0 : index
    %29 = vector.load %arg5[%c0_14, %c0_15, %c0_16] : memref<4x32x16xf32, #tpu.memory_space<vmem>>, vector<4x32x16xf32>
    "tpu.trace_start"() <{level = 10 : i32, message = "hnd,hdk->hnk"}> : () -> ()
    %cst_17 = arith.constant dense<0.000000e+00> : vector<4x8x16xf32>
    %30 = tpu.matmul %26, %29, %cst_17 {dimension_numbers = #tpu.dot_dimension_numbers<[2], [1], [1], [2], [0, 0, 0, 1, 1, 2], [0], [0]>} : vector<4x8x32xf32>, vector<4x32x16xf32>, vector<4x8x16xf32> -> vector<4x8x16xf32>
    "tpu.trace_stop"() : () -> ()
    %c0_18 = arith.constant 0 : index
    %c0_19 = arith.constant 0 : index
    %c0_20 = arith.constant 0 : index
    %31 = vector.load %arg6[%c0_18, %c0_19, %c0_20] : memref<4x32x16xf32, #tpu.memory_space<vmem>>, vector<4x32x16xf32>
    "tpu.trace_start"() <{level = 10 : i32, message = "hnd,hdk->hnk"}> : () -> ()
    %cst_21 = arith.constant dense<0.000000e+00> : vector<4x8x16xf32>
    %32 = tpu.matmul %26, %31, %cst_21 {dimension_numbers = #tpu.dot_dimension_numbers<[2], [1], [1], [2], [0, 0, 0, 1, 1, 2], [0], [0]>} : vector<4x8x32xf32>, vector<4x32x16xf32>, vector<4x8x16xf32> -> vector<4x8x16xf32>
    "tpu.trace_stop"() : () -> ()
    "tpu.trace_start"() <{level = 10 : i32, message = "hnk,hmk->hnm"}> : () -> ()
    %cst_22 = arith.constant dense<0.000000e+00> : vector<4x8x8xf32>
    %33 = tpu.matmul %28, %30, %cst_22 {dimension_numbers = #tpu.dot_dimension_numbers<[2], [2], [1], [1], [0, 0, 0, 1, 1, 1], [0], [0]>} : vector<4x8x16xf32>, vector<4x8x16xf32>, vector<4x8x8xf32> -> vector<4x8x8xf32>
    "tpu.trace_stop"() : () -> ()
    %cst_23 = arith.constant dense<0xFF800000> : vector<4x8xf32>
    %34 = vector.multi_reduction <maximumf>, %33, %cst_23 [2] : vector<4x8x8xf32> to vector<4x8xf32>
    %35 = vector.shape_cast %34 : vector<4x8xf32> to vector<4x8x1xf32>
    %36 = vector.broadcast %35 : vector<4x8x1xf32> to vector<4x8x8xf32>
    %37 = arith.subf %33, %36 : vector<4x8x8xf32>
    %38 = math.exp %37 : vector<4x8x8xf32>
    %cst_24 = arith.constant dense<0.000000e+00> : vector<4x8xf32>
    %39 = vector.multi_reduction <add>, %38, %cst_24 [2] : vector<4x8x8xf32> to vector<4x8xf32>
    %40 = vector.shape_cast %39 : vector<4x8xf32> to vector<4x8x1xf32>
    "tpu.trace_start"() <{level = 10 : i32, message = "hnm,hmk->hnk"}> : () -> ()
    %cst_25 = arith.constant dense<0.000000e+00> : vector<4x8x16xf32>
    %41 = tpu.matmul %38, %32, %cst_25 {dimension_numbers = #tpu.dot_dimension_numbers<[2], [1], [1], [2], [0, 0, 0, 1, 1, 2], [0], [0]>} : vector<4x8x8xf32>, vector<4x8x16xf32>, vector<4x8x16xf32> -> vector<4x8x16xf32>
    "tpu.trace_stop"() : () -> ()
    %42 = tpu.reciprocal %40 {approx = true} : vector<4x8x1xf32> -> vector<4x8x1xf32>
    %43 = vector.broadcast %42 : vector<4x8x1xf32> to vector<4x8x16xf32>
    %44 = arith.mulf %41, %43 : vector<4x8x16xf32>
    %c0_26 = arith.constant 0 : index
    %c0_27 = arith.constant 0 : index
    %c0_28 = arith.constant 0 : index
    %45 = vector.load %arg7[%c0_26, %c0_27, %c0_28] : memref<4x16x32xf32, #tpu.memory_space<vmem>>, vector<4x16x32xf32>
    "tpu.trace_start"() <{level = 10 : i32, message = "hnk,hkd->hnd"}> : () -> ()
    %cst_29 = arith.constant dense<0.000000e+00> : vector<4x8x32xf32>
    %46 = tpu.matmul %44, %45, %cst_29 {dimension_numbers = #tpu.dot_dimension_numbers<[2], [1], [1], [2], [0, 0, 0, 1, 1, 2], [0], [0]>} : vector<4x8x16xf32>, vector<4x16x32xf32>, vector<4x8x32xf32> -> vector<4x8x32xf32>
    "tpu.trace_stop"() : () -> ()
    %cst_30 = arith.constant dense<0.000000e+00> : vector<8x32xf32>
    %47 = vector.multi_reduction <add>, %46, %cst_30 [0] : vector<4x8x32xf32> to vector<8x32xf32>
    %c0_31 = arith.constant 0 : index
    %c0_32 = arith.constant 0 : index
    %48 = vector.load %arg8[%c0_31, %c0_32] : memref<1x32xf32, #tpu.memory_space<vmem>>, vector<1x32xf32>
    %49 = vector.broadcast %48 : vector<1x32xf32> to vector<8x32xf32>
    %50 = arith.addf %47, %49 : vector<8x32xf32>
    %c0_33 = arith.constant 0 : index
    %c0_34 = arith.constant 0 : index
    %c0_35 = arith.constant 0 : index
    %51 = vector.load %arg9[%c0_33, %c0_34, %c0_35] : memref<1x8x32xf32, #tpu.memory_space<vmem>>, vector<1x8x32xf32>
    %52 = vector.shape_cast %51 : vector<1x8x32xf32> to vector<8x32xf32>
    %53 = vector.shape_cast %50 : vector<8x32xf32> to vector<1x8x32xf32>
    tpu.vector_store %arg9[%c0_33, %c0_34, %c0_35], %53 {strides = array<i32>} : memref<1x8x32xf32, #tpu.memory_space<vmem>>, vector<1x8x32xf32>,
    return
  }
  func.func @transform_0(%arg0: i32) -> (i32, i32, i32) {
    %c0_i32 = arith.constant 0 : i32
    %c0_i32_0 = arith.constant 0 : i32
    %c0_i32_1 = arith.constant 0 : i32
    return %arg0, %c0_i32, %c0_i32_0 : i32, i32, i32
  }
  func.func @transform_1(%arg0: i32) -> (i32, i32) {
    %c0_i32 = arith.constant 0 : i32
    %c0_i32_0 = arith.constant 0 : i32
    %c0_i32_1 = arith.constant 0 : i32
    return %c0_i32, %c0_i32_0 : i32, i32
  }
  func.func @transform_2(%arg0: i32) -> (i32, i32) {
    %c0_i32 = arith.constant 0 : i32
    %c0_i32_0 = arith.constant 0 : i32
    %c0_i32_1 = arith.constant 0 : i32
    return %c0_i32, %c0_i32_0 : i32, i32
  }
  func.func @transform_3(%arg0: i32) -> (i32, i32, i32) {
    %c0_i32 = arith.constant 0 : i32
    %c0_i32_0 = arith.constant 0 : i32
    %c0_i32_1 = arith.constant 0 : i32
    %c0_i32_2 = arith.constant 0 : i32
    return %c0_i32, %c0_i32_0, %c0_i32_1 : i32, i32, i32
  }
  func.func @transform_4(%arg0: i32) -> (i32, i32, i32) {
    %c0_i32 = arith.constant 0 : i32
    %c0_i32_0 = arith.constant 0 : i32
    %c0_i32_1 = arith.constant 0 : i32
    %c0_i32_2 = arith.constant 0 : i32
    return %c0_i32, %c0_i32_0, %c0_i32_1 : i32, i32, i32
  }
  func.func @transform_5(%arg0: i32) -> (i32, i32, i32) {
    %c0_i32 = arith.constant 0 : i32
    %c0_i32_0 = arith.constant 0 : i32
    %c0_i32_1 = arith.constant 0 : i32
    %c0_i32_2 = arith.constant 0 : i32
    return %c0_i32, %c0_i32_0, %c0_i32_1 : i32, i32, i32
  }
  func.func @transform_6(%arg0: i32) -> (i32, i32, i32) {
    %c0_i32 = arith.constant 0 : i32
    %c0_i32_0 = arith.constant 0 : i32
    %c0_i32_1 = arith.constant 0 : i32
    %c0_i32_2 = arith.constant 0 : i32
    return %c0_i32, %c0_i32_0, %c0_i32_1 : i32, i32, i32
  }
  func.func @transform_7(%arg0: i32) -> (i32, i32) {
    %c0_i32 = arith.constant 0 : i32
    %c0_i32_0 = arith.constant 0 : i32
    %c0_i32_1 = arith.constant 0 : i32
    return %c0_i32, %c0_i32_0 : i32, i32
  }
  func.func @transform_8(%arg0: i32) -> (i32, i32, i32) {
    %c0_i32 = arith.constant 0 : i32
    %c0_i32_0 = arith.constant 0 : i32
    %c0_i32_1 = arith.constant 0 : i32
    return %arg0, %c0_i32, %c0_i32_0 : i32, i32, i32
  }
}

</mosaic_0001>

<bundles_post_ra>
// kernel: attention_forward.1
= control target key start
LH: loop header
LB: loop body
LE: loop exit
PB: predicated region body
PF: predicated region fallthrough
CT: control target
= control target key end

     0   :  { %13 = vsyncpa [#allocation3], 0  ;;  %s3259_s0 = inlined_call_operand.vmem [shape: f32[2,8,32], index: 0, kind: input, shape index: {}]   ;;  %s3260_s1 = inlined_call_operand.vmem [shape: f32[1,32], index: 1, kind: input, shape index: {}]   ;;  %s3261_s2 = inlined_call_operand.vmem [shape: f32[1,32], index: 2, kind: input, shape index: {}]   ;;  %s3262_s3 = inlined_call_operand.vmem [shape: f32[4,32,16], index: 3, kind: input, shape index: {}]   ;;  %s3263_s4 = inlined_call_operand.vmem [shape: f32[4,32,16], index: 4, kind: input, shape index: {}]   ;;  %s3264_s5 = inlined_call_operand.vmem [shape: f32[4,32,16], index: 5, kind: input, shape index: {}]   ;;  %s3265_s6 = inlined_call_operand.vmem [shape: f32[4,16,32], index: 6, kind: input, shape index: {}]   ;;  %s3266_s7 = inlined_call_operand.vmem [shape: f32[1,32], index: 7, kind: input, shape index: {}]   ;;  %s3267_s8 = inlined_call_operand.hbm [shape: f32[2,8,32], index: 8, kind: output, shape index: {}]  }
   0x1   :  { %15 = vsyncpa [#allocation3 + $0x1], 0  ;;  %s2841_s27 = smov 0   ;;  %s2843_s28 = smov 0  }
   0x2   :  { %s2845_s29 = smov 0   ;;  %s2847_s30 = smov 0  }
   0x3 LB: > { %s2862_s9 = sadd.s32 4294967295, %s2790_s30   ;;  %s2255_s10 = sadd.s32 4294967294, %s2790_s30   ;;  %s2790_s30 = sphi %s2847_s30, %s3273_s30   ;;  %s2786_s29 = sphi %s2845_s29, %s3272_s29   ;;  %s2782_s28 = sphi %s2843_s28, %s3271_s28   ;;  %s2778_s27 = sphi %s2841_s27, %s3270_s27  }
   0x4   : > { %s2866_s11 = sadd.s32 1, %s2790_s30   ;;  %s201_s12 = sadd.s32 1, %s2786_s29 }
   0x5   : > { %s198_s13 = ssub.s32 %s2790_s30, %s2866_s11  ;;  %p211_p0 = scmp.ne.s32.totalorder %s2786_s29, %s2782_s28 }
   0x6   : > { %p199_p1 = scmp.eq.s32.totalorder %s198_s13, 0  ;;  %p212_p2 = scmp.eq.s32.totalorder %s2862_s9, 1 }
   0x7   : > { %p217_p3 = scmp.ne.s32.totalorder %s2782_s28, %s2778_s27  ;;  %p218_p4 = scmp.eq.s32.totalorder %s2255_s10, 1 }
   0x8   : > { %s2877_s14 = scalar_select %p199_p1, %s2786_s29, %s201_s12  }
   0x9   : > { %p2879_p5 = por %p212_p2, %p211_p0  ;;  %p2883_p6 = por %p218_p4, %p217_p3 }
   0xa   : > { %p2258_p7 = scmp.ge.s32.totalorder %s2790_s30, 1  ;;  %p264_p8 = scmp.lt.s32.totalorder %s2790_s30, 3 }
   0xc   : > { %p265_p9 = pnand %p2258_p7, %p264_p8 }
   0xd   : > { %p297_p10 = scmp.lt.s32.totalorder (!%p265_p9), %s2862_s9, 1  ;;  %vm304_vm0 = vcmask (!%p265_p9), 261120   ;;  %v333_v7 = vld [vmem:[%s3262_s3] sm:$0xff] (!%p265_p9)  ;;  %v334_v8 = vld [vmem:[%s3262_s3 + $0x8] sm:$0xff] (!%p265_p9)  ;;  %v2792_v12 = vmov (!%p265_p9), 0.0|0.0   ;;  %v335_v14 = vld [vmem:[%s3262_s3 + $0x10] sm:$0xff] (!%p265_p9) }
   0xe   : > { %268 = sbr.rel (%p265_p9) target bundleno = 1396 (0x574), region = 52  ;;  %v337_v9 = vld [vmem:[%s3262_s3 + $0x20] sm:$0xff] (!%p265_p9)  ;;  %v2585_v10 = vpack.c.bf16 (!%p265_p9), %v334_v8, %v333_v7  ;;  %v338_v11 = vld [vmem:[%s3262_s3 + $0x28] sm:$0xff] (!%p265_p9)  ;;  %2584 = vmatprep.subr.bf16.mxu0 (!%p265_p9), %v2792_v12  ;;  %2590 = vmatprep.subr.bf16.mxu1 (!%p265_p9), %v2792_v12  ;;  %v336_v15 = vld [vmem:[%s3262_s3 + $0x18] sm:$0xff] (!%p265_p9)  ;;  %vm2793_vm1 = vmmov (!%p265_p9), 0   ;;  %v2794_v20 = vmov (!%p265_p9), 0.0  }
   0xf   : > { %v2591_v13 = vpack.c.bf16 (!%p265_p9), %v338_v11, %v337_v9  ;;  %v339_v16 = vld [vmem:[%s3262_s3 + $0x30] sm:$0xff] (!%p265_p9)  ;;  %v2588_v17 = vpack.c.bf16 (!%p265_p9), %v336_v15, %v335_v14  ;;  %v340_v18 = vld [vmem:[%s3262_s3 + $0x38] sm:$0xff] (!%p265_p9)  ;;  %2392 = vmatprep.mubr.msk.f32.mxu0 (!%p265_p9), %vm2793_vm1, %v2794_v20  ;;  %2403 = vmatprep.mubr.msk.f32.mxu1 (!%p265_p9), %vm2793_vm1, %v2794_v20  ;;  %v2261_v25 = vld [vmem:[%s3260_s1] ss:$0 sm:$0xff] (!%p265_p9)  ;;  %vm1224_vm2 = vcmask (!%p265_p9), 130048   ;;  %vm1529_vm3 = vcmask (!%p265_p9), 64512  }
  0x10   : > { %2586 = vmatpush3.bf16.msra.mxu0 (!%p265_p9), %v2585_v10  ;;  %v2594_v19 = vpack.c.bf16 (!%p265_p9), %v340_v18, %v339_v16  ;;  %v341_v26 = vld [vmem:[%s3262_s3 + $0x40] sm:$0xff] (!%p265_p9)  ;;  %v342_v28 = vld [vmem:[%s3262_s3 + $0x48] sm:$0xff] (!%p265_p9)  ;;  %v343_v35 = vld [vmem:[%s3262_s3 + $0x50] sm:$0xff] (!%p265_p9)  ;;  %s2293_s25 = sshll.u32 (!%p265_p9), %s2862_s9, 7 }
  0x11   : > { %2592 = vmatpush3.bf16.msra.mxu1 (!%p265_p9), %v2591_v13  ;;  %2587 = vmatprep.subr.bf16.mxu0 (!%p265_p9), %v2792_v12  ;;  %v345_v29 = vld [vmem:[%s3262_s3 + $0x60] sm:$0xff] (!%p265_p9)  ;;  %v346_v30 = vld [vmem:[%s3262_s3 + $0x68] sm:$0xff] (!%p265_p9)  ;;  %v2597_v33 = vpack.c.bf16 (!%p265_p9), %v342_v28, %v341_v26  ;;  %v344_v37 = vld [vmem:[%s3262_s3 + $0x58] sm:$0xff] (!%p265_p9) }
  0x12   : > { %2593 = vmatprep.subr.bf16.mxu1 (!%p265_p9), %v2792_v12  ;;  %v2262_v31 = vld [vmem:[%s3261_s2] ss:$0 sm:$0xff] (!%p265_p9)  ;;  %v2603_v34 = vpack.c.bf16 (!%p265_p9), %v346_v30, %v345_v29  ;;  %v347_v38 = vld [vmem:[%s3262_s3 + $0x70] sm:$0xff] (!%p265_p9)  ;;  %v348_v39 = vld [vmem:[%s3262_s3 + $0x78] sm:$0xff] (!%p265_p9)  ;;  %v2600_v40 = vpack.c.bf16 (!%p265_p9), %v344_v37, %v343_v35 }
  0x13   : > { %v2606_v41 = vpack.c.bf16 (!%p265_p9), %v348_v39, %v347_v38  ;;  %v632_v42 = vld [vmem:[%s3263_s4] sm:$0xff] (!%p265_p9)  ;;  %v633_v43 = vld [vmem:[%s3263_s4 + $0x8] sm:$0xff] (!%p265_p9)  ;;  %v634_v48 = vld [vmem:[%s3263_s4 + $0x10] sm:$0xff] (!%p265_p9) }
  0x14   : > { %2589 = vmatpush3.bf16.msra.mxu0 (!%p265_p9), %v2588_v17  ;;  %v636_v44 = vld [vmem:[%s3263_s4 + $0x20] sm:$0xff] (!%p265_p9)  ;;  %v637_v45 = vld [vmem:[%s3263_s4 + $0x28] sm:$0xff] (!%p265_p9)  ;;  %v2609_v46 = vpack.c.bf16 (!%p265_p9), %v633_v43, %v632_v42  ;;  %v635_v49 = vld [vmem:[%s3263_s4 + $0x18] sm:$0xff] (!%p265_p9) }
  0x15   : > { %s298_s17 = scalar_select %p297_p10, %s2862_s9, 1  ;;  %2595 = vmatpush3.bf16.msra.mxu1 %v2594_v19  ;;  %2596 = vmatprep.subr.bf16.mxu0 %v2792_v12  ;;  %v2615_v47 = vpack.c.bf16 %v637_v45, %v636_v44  ;;  %v638_v50 = vld [vmem:[%s3263_s4 + $0x30] sm:$0xff]  ;;  %v639_v51 = vld [vmem:[%s3263_s4 + $0x38] sm:$0xff]  ;;  %v2612_v52 = vpack.c.bf16 %v635_v49, %v634_v48  ;;  %v640_v54 = vld [vmem:[%s3263_s4 + $0x40] sm:$0xff] }
  0x16   : > { %2602 = vmatprep.subr.bf16.mxu1 %v2792_v12  ;;  %v2618_v53 = vpack.c.bf16 %v639_v51, %v638_v50  ;;  %v641_v55 = vld [vmem:[%s3263_s4 + $0x48] sm:$0xff]  ;;  %v644_v56 = vld [vmem:[%s3263_s4 + $0x60] sm:$0xff]  ;;  %v642_v60 = vld [vmem:[%s3263_s4 + $0x50] sm:$0xff]  ;;  %s2795_s9 = smov [#allocation2]  }
  0x17   : > { %s2260_s18 = sshll.u32 %s298_s17, 3  ;;  %v645_v57 = vld [vmem:[%s3263_s4 + $0x68] sm:$0xff]  ;;  %v2621_v58 = vpack.c.bf16 %v641_v55, %v640_v54  ;;  %v643_v61 = vld [vmem:[%s3263_s4 + $0x58] sm:$0xff]  ;;  %v646_v62 = vld [vmem:[%s3263_s4 + $0x70] sm:$0xff]  ;;  %s3216_s17 = scalar_lea.hbm %s3267_s8, %s2293_s25 }
  0x18   : > { %s300_s21 = scalar_lea.vmem %s3259_s0, %s2260_s18  ;;  %v2627_v59 = vpack.c.bf16 %v645_v57, %v644_v56  ;;  %v647_v63 = vld [vmem:[%s3263_s4 + $0x78] sm:$0xff]  ;;  %v930_v8 = vld [vmem:[%s3264_s5 + $0x10] sm:$0xff]  ;;  %v936_v15 = vld [vmem:[%s3264_s5 + $0x40] sm:$0xff]  ;;  %s2732_s20 = sshll.u32 %s2795_s9, 4  ;;  %s2733_s20 = int_to_ptr.vmem [resolvable:$false] %s2732_s20 }
  0x19   : > { %v301_v0 = vld [vmem:[%s300_s21] sm:$0xff]  ;;  %v931_v9 = vld [vmem:[%s3264_s5 + $0x18] sm:$0xff]  ;;  %v934_v10 = vld [vmem:[%s3264_s5 + $0x30] sm:$0xff]  ;;  %s294_s21 = sand.u32 1, %s2782_s28  }
  0x1a   : > { %v305_v1 = vsel %vm304_vm0, %v301_v0, 0.0  ;;  %v935_v11 = vld [vmem:[%s3264_s5 + $0x38] sm:$0xff]  ;;  %v2636_v13 = vpack.c.bf16 %v931_v9, %v930_v8  ;;  %v937_v16 = vld [vmem:[%s3264_s5 + $0x48] sm:$0xff]  ;;  %v940_v17 = vld [vmem:[%s3264_s5 + $0x60] sm:$0xff]  ;;  %s2259_s22 = sshll.u32 %s294_s21, 3  ;;  %s2183_s18 = scalar_lea.sflag [#allocation3], %s294_s21 }
  0x1b   : > { %306 = vadd.xlane.f32.xlu0 %v305_v1  ;;  %v2630_v1 = vpack.c.bf16 %v647_v63, %v646_v62  ;;  %v2642_v14 = vpack.c.bf16 %v935_v11, %v934_v10  ;;  %v941_v18 = vld [vmem:[%s3264_s5 + $0x68] sm:$0xff]  ;;  %v2645_v19 = vpack.c.bf16 %v937_v16, %v936_v15  ;;  %s296_s26 = scalar_lea.vmem [#allocation2], %s2259_s22  ;;  %s2734_s22 = scalar_lea.vmem %s2733_s20, 256 }
  0x1c   : > { %s2196_s10 = sshll.u32 %s296_s26, 4  ;;  %s3218_s10 = int_to_ptr.vmem [resolvable:$true] %s2196_s10 }
  0x1d   : > { %s2728_s19 = scalar_lea.vmem %s3218_s10, 128  ;;  %p2735_p0 = scmp.lt.s32.totalorder %s3218_s10, %s2733_s20 }
  0x1e   : > { %p2729_p11 = scmp.ne.s32.totalorder %s3218_s10, %s2728_s19  ;;  %p2736_p1 = scmp.lt.s32.totalorder %s2734_s22, %s2728_s19 }
  0x20   : > { %p2730_p12 = pnand %p2729_p11, %p2879_p5  ;;  %p2737_p2 = por %p2736_p1, %p2735_p0 }
  0x22   : > { %p2731_p13 = pneg %p2730_p12 }
  0x24   : > { %p2738_p3 = pnand %p2737_p2, %p2731_p13 }
  0xa8   : > { %v307_v2 = vpop.xlane.xlu0 %306 }
  0xa9   : > { %v309_v3 = vmul.f32 0.03125, %v307_v2  ;;  %v928_v2 = vld [vmem:[%s3264_s5] sm:$0xff] }
  0xab   : > { %v310_v4 = vsub.f32 %v301_v0, %v309_v3  ;;  %v2624_v0 = vpack.c.bf16 %v643_v61, %v642_v60  ;;  %v929_v3 = vld [vmem:[%s3264_s5 + $0x8] sm:$0xff] }
  0xad   : > { %v311_v5 = vmul.f32 %v310_v4, %v310_v4 }
  0xaf   : > { %v312_v6 = vsel %vm304_vm0, %v311_v5, 0.0  ;;  %v933_v5 = vld [vmem:[%s3264_s5 + $0x28] sm:$0xff] }
  0xb0   : > { %313 = vadd.xlane.f32.xlu0 %v312_v6  ;;  %v2633_v6 = vpack.c.bf16 %v929_v3, %v928_v2 }
 0x13d   : > { %v314_v21 = vpop.xlane.xlu0 %313 }
 0x13e   : > { %v315_v22 = vmul.f32 0.03125, %v314_v21  ;;  %v2651_v21 = vpack.c.bf16 %v941_v18, %v940_v17 }
 0x140   : > { %v316_v23 = vadd.f32 1e-05, %v315_v22  ;;  %v938_v22 = vld [vmem:[%s3264_s5 + $0x50] sm:$0xff] }
 0x142   : > { %2710 = vrsqrt.f32 %v316_v23  ;;  %v939_v23 = vld [vmem:[%s3264_s5 + $0x58] sm:$0xff] }
 0x143   : > { %v2648_v26 = vpack.c.bf16 %v939_v23, %v938_v22  ;;  %v1866_v22 = vld [vmem:[%s3265_s6] sm:$0xff]  ;;  %v1867_v23 = vld [vmem:[%s3265_s6 + $0x8] sm:$0xff] }
 0x14c   : > { %v2711_v24 = vpop.eup %2710 }
 0x14d   : > { %v318_v27 = vmul.f32 %v2711_v24, %v310_v4  ;;  %v932_v4 = vld [vmem:[%s3264_s5 + $0x20] sm:$0xff]  ;;  %v942_v24 = vld [vmem:[%s3264_s5 + $0x70] sm:$0xff] }
 0x14e   : > { %v2639_v7 = vpack.c.bf16 %v933_v5, %v932_v4 }
 0x14f   : > { %v325_v32 = vmul.f32 %v2261_v25, %v318_v27  ;;  %v943_v25 = vld [vmem:[%s3264_s5 + $0x78] sm:$0xff] }
 0x150   : > { %v2654_v27 = vpack.c.bf16 %v943_v25, %v942_v24  ;;  %v2657_v24 = vpack.c.bf16 %v1867_v23, %v1866_v22  ;;  %v1868_v25 = vld [vmem:[%s3265_s6 + $0x10] sm:$0xff] }
 0x151   : > { %v2951_v36 = vadd.f32 %v2262_v31, %v325_v32 }
 0x153   : > { %2393 = vmatmul.mubr.msk.f32.vlgmr.msra.gmra.mrb[0].mxu0 %vm304_vm0, %v2951_v36  ;;  %2404 = vmatmul.mubr.msk.f32.vlgmr.msra.gmra.mrb[0].mxu1 %vm304_vm0, %v2951_v36 }
 0x154   : > { %2598 = vmatpush3.bf16.msra.mxu0 %v2597_v33  ;;  %2604 = vmatpush3.bf16.msra.mxu1 %v2603_v34 }
 0x155   : > { %2599 = vmatprep.subr.bf16.mxu0 %v2792_v12  ;;  %2605 = vmatprep.subr.bf16.mxu1 %v2792_v12 }
 0x156   : > { %2414 = vmatprep.mubr.msk.f32.mxu0 %vm2793_vm1, %v2794_v20  ;;  %2425 = vmatprep.mubr.msk.f32.mxu1 %vm2793_vm1, %v2794_v20 }
 0x158   : > { %2601 = vmatpush3.bf16.msra.mxu0 %v2600_v40  ;;  %2607 = vmatpush3.bf16.msra.mxu1 %v2606_v41 }
 0x159   : > { %2608 = vmatprep.subr.bf16.mxu0 %v2792_v12  ;;  %2614 = vmatprep.subr.bf16.mxu1 %v2792_v12 }
 0x15b   : > { %2415 = vmatmul.mubr.msk.f32.vlgmr.msra.gmra.mrb[2].mxu0 %vm304_vm0, %v2951_v36  ;;  %2426 = vmatmul.mubr.msk.f32.vlgmr.msra.gmra.mrb[2].mxu1 %vm304_vm0, %v2951_v36 }
 0x15c   : > { %2610 = vmatpush3.bf16.msra.mxu0 %v2609_v46  ;;  %2616 = vmatpush3.bf16.msra.mxu1 %v2615_v47 }
 0x15d   : > { %2611 = vmatprep.subr.bf16.mxu0 %v2792_v12  ;;  %2617 = vmatprep.subr.bf16.mxu1 %v2792_v12 }
 0x15e   : > { %2436 = vmatprep.mubr.msk.f32.mxu0 %vm2793_vm1, %v2794_v20  ;;  %2447 = vmatprep.mubr.msk.f32.mxu1 %vm2793_vm1, %v2794_v20 }
 0x160   : > { %2613 = vmatpush3.bf16.msra.mxu0 %v2612_v52  ;;  %2619 = vmatpush3.bf16.msra.mxu1 %v2618_v53 }
 0x161   : > { %2620 = vmatprep.subr.bf16.mxu0 %v2792_v12  ;;  %2626 = vmatprep.subr.bf16.mxu1 %v2792_v12 }
 0x163   : > { %2437 = vmatmul.mubr.msk.f32.vlgmr.msra.gmra.mrb[4].mxu0 %vm304_vm0, %v2951_v36  ;;  %2448 = vmatmul.mubr.msk.f32.vlgmr.msra.gmra.mrb[4].mxu1 %vm304_vm0, %v2951_v36 }
 0x164   : > { %2622 = vmatpush3.bf16.msra.mxu0 %v2621_v58  ;;  %2628 = vmatpush3.bf16.msra.mxu1 %v2627_v59 }
 0x165   : > { %2623 = vmatprep.subr.bf16.mxu0 %v2792_v12  ;;  %2629 = vmatprep.subr.bf16.mxu1 %v2792_v12 }
 0x166   : > { %2458 = vmatprep.mubr.msk.f32.mxu0 %vm2793_vm1, %v2794_v20  ;;  %2469 = vmatprep.mubr.msk.f32.mxu1 %vm2793_vm1, %v2794_v20 }
 0x168   : > { %2625 = vmatpush3.bf16.msra.mxu0 %v2624_v0  ;;  %2631 = vmatpush3.bf16.msra.mxu1 %v2630_v1 }
 0x169   : > { %2632 = vmatprep.subr.bf16.mxu0 %v2792_v12  ;;  %2638 = vmatprep.subr.bf16.mxu1 %v2792_v12 }
 0x16b   : > { %2459 = vmatmul.mubr.msk.f32.vlgmr.msra.gmra.mrb[6].mxu0 %vm304_vm0, %v2951_v36  ;;  %2470 = vmatmul.mubr.msk.f32.vlgmr.msra.gmra.mrb[6].mxu1 %vm304_vm0, %v2951_v36 }
 0x16c   : > { %2634 = vmatpush3.bf16.msra.mxu0 %v2633_v6  ;;  %2640 = vmatpush3.bf16.msra.mxu1 %v2639_v7 }
 0x16d   : > { %2635 = vmatprep.subr.bf16.mxu0 %v2792_v12  ;;  %2641 = vmatprep.subr.bf16.mxu1 %v2792_v12 }
 0x16e   : > { %2480 = vmatprep.mubr.msk.f32.mxu0 %vm2793_vm1, %v2794_v20  ;;  %2491 = vmatprep.mubr.msk.f32.mxu1 %vm2793_vm1, %v2794_v20 }
 0x170   : > { %2637 = vmatpush3.bf16.msra.mxu0 %v2636_v13  ;;  %2643 = vmatpush3.bf16.msra.mxu1 %v2642_v14 }
 0x171   : > { %2644 = vmatprep.subr.bf16.mxu0 %v2792_v12  ;;  %2650 = vmatprep.subr.bf16.mxu1 %v2792_v12 }
 0x173   : > { %2481 = vmatmul.mubr.msk.f32.vlgmr.msra.gmra.mrb[8].mxu0 %vm304_vm0, %v2951_v36  ;;  %2492 = vmatmul.mubr.msk.f32.vlgmr.msra.gmra.mrb[8].mxu1 %vm304_vm0, %v2951_v36 }
 0x174   : > { %2646 = vmatpush3.bf16.msra.mxu0 %v2645_v19  ;;  %2652 = vmatpush3.bf16.msra.mxu1 %v2651_v21 }
 0x175   : > { %2647 = vmatprep.subr.bf16.mxu0 %v2792_v12  ;;  %2653 = vmatprep.subr.bf16.mxu1 %v2792_v12 }
 0x176   : > { %2502 = vmatprep.mubr.msk.f32.mxu0 %vm2793_vm1, %v2794_v20  ;;  %2513 = vmatprep.mubr.msk.f32.mxu1 %vm2793_vm1, %v2794_v20 }
 0x178   : > { %2649 = vmatpush3.bf16.msra.mxu0 %v2648_v26  ;;  %2655 = vmatpush3.bf16.msra.mxu1 %v2654_v27  ;;  %v1869_v26 = vld [vmem:[%s3265_s6 + $0x18] sm:$0xff] }
 0x179   : > { %2516 = vmatprep.subr.mxu0 %v2794_v20  ;;  %2521 = vmatprep.subr.mxu1 %v2794_v20  ;;  %v2660_v27 = vpack.c.bf16 %v1869_v26, %v1868_v25 }
 0x17b   : > { %2503 = vmatmul.mubr.msk.f32.vlgmr.msra.gmra.mrb[10].mxu0 %vm304_vm0, %v2951_v36  ;;  %2514 = vmatmul.mubr.msk.f32.vlgmr.msra.gmra.mrb[10].mxu1 %vm304_vm0, %v2951_v36 }
 0x17c   : > { %2518 = vmatprep.mubr.msk.f32.mxu0 %vm2793_vm1, %v2794_v20  ;;  %2523 = vmatprep.mubr.msk.f32.mxu1 %vm2793_vm1, %v2794_v20 }
 0x226   : > { %v418_v28 = vpop.f32.mrb[0].mxu0  ;;  %v488_v29 = vpop.f32.mrb[0].mxu1 }
 0x227   : > { %v2394_v30 = vpop.f32.mrb[1].mxu0  ;;  %v2405_v31 = vpop.f32.mrb[1].mxu1 }
 0x22e   : > { %v558_v32 = vpop.f32.mrb[2].mxu0  ;;  %v628_v33 = vpop.f32.mrb[2].mxu1 }
 0x22f   : > { %v2416_v34 = vpop.f32.mrb[3].mxu0  ;;  %v2427_v35 = vpop.f32.mrb[3].mxu1 }
 0x236   : > { %v714_v37 = vpop.f32.mrb[4].mxu0  ;;  %v784_v38 = vpop.f32.mrb[4].mxu1 }
 0x237   : > { %v2438_v39 = vpop.f32.mrb[5].mxu0  ;;  %v2449_v40 = vpop.f32.mrb[5].mxu1  ;;  %2517 = vmatpush3.xpose.msk.msra.mxu0 %vm1224_vm2, %v714_v37  ;;  %2522 = vmatpush3.xpose.msk.msra.mxu1 %vm1224_vm2, %v784_v38 }
 0x238   : > { %2526 = vmatprep.subr.mxu0 %v2794_v20  ;;  %2531 = vmatprep.subr.mxu1 %v2794_v20  ;;  %v1872_v39 = vld [vmem:[%s3265_s6 + $0x30] sm:$0xff]  ;;  %v1873_v40 = vld [vmem:[%s3265_s6 + $0x38] sm:$0xff] }
 0x23a   : > { %2519 = vmatmul.mubr.msk.f32.vlgmr.msra.gmra.mrb[12].mxu0 %vm1224_vm2, %v418_v28  ;;  %2524 = vmatmul.mubr.msk.f32.vlgmr.msra.gmra.mrb[12].mxu1 %vm1224_vm2, %v488_v29 }
 0x23b   : > { %2528 = vmatprep.mubr.msk.f32.mxu0 %vm2793_vm1, %v2794_v20  ;;  %2533 = vmatprep.mubr.msk.f32.mxu1 %vm2793_vm1, %v2794_v20 }
 0x23e   : > { %v854_v36 = vpop.f32.mrb[6].mxu0  ;;  %v924_v41 = vpop.f32.mrb[6].mxu1 }
 0x23f   : > { %v2460_v42 = vpop.f32.mrb[7].mxu0  ;;  %v2471_v43 = vpop.f32.mrb[7].mxu1  ;;  %2527 = vmatpush3.xpose.msk.msra.mxu0 %vm1224_vm2, %v854_v36  ;;  %2532 = vmatpush3.xpose.msk.msra.mxu1 %vm1224_vm2, %v924_v41 }
 0x240   : > { %2536 = vmatprep.subr.mxu0 %v2794_v20  ;;  %2541 = vmatprep.subr.mxu1 %v2794_v20  ;;  %v2666_v42 = vpack.c.bf16 %v1873_v40, %v1872_v39 }
 0x242   : > { %2529 = vmatmul.mubr.msk.f32.vlgmr.msra.gmra.mrb[14].mxu0 %vm1224_vm2, %v558_v32  ;;  %2534 = vmatmul.mubr.msk.f32.vlgmr.msra.gmra.mrb[14].mxu1 %vm1224_vm2, %v628_v33  ;;  %v1870_v32 = vld [vmem:[%s3265_s6 + $0x20] sm:$0xff]  ;;  %v1871_v33 = vld [vmem:[%s3265_s6 + $0x28] sm:$0xff] }
 0x243   : > { %2538 = vmatprep.mubr.msk.f32.mxu0 %vm2793_vm1, %v2794_v20  ;;  %2543 = vmatprep.mubr.msk.f32.mxu1 %vm2793_vm1, %v2794_v20  ;;  %v2663_v37 = vpack.c.bf16 %v1871_v33, %v1870_v32 }
 0x246   : > { %v1010_v44 = vpop.f32.mrb[8].mxu0  ;;  %v1080_v45 = vpop.f32.mrb[8].mxu1 }
 0x247   : > { %v2482_v46 = vpop.f32.mrb[9].mxu0  ;;  %v2493_v47 = vpop.f32.mrb[9].mxu1  ;;  %2537 = vmatpush3.msra.mxu0 %v1010_v44  ;;  %2542 = vmatpush3.msra.mxu1 %v1080_v45 }
 0x248   : > { %2546 = vmatprep.subr.mxu0 %v2794_v20  ;;  %2551 = vmatprep.subr.mxu1 %v2794_v20 }
 0x24e   : > { %v1150_v48 = vpop.f32.mrb[10].mxu0  ;;  %v1220_v49 = vpop.f32.mrb[10].mxu1 }
 0x24f   : > { %v2504_v50 = vpop.f32.mrb[11].mxu0  ;;  %v2515_v51 = vpop.f32.mrb[11].mxu1 }
 0x30d   : > { %v1297_v52 = vpop.f32.mrb[12].mxu0  ;;  %v1373_v53 = vpop.f32.mrb[12].mxu1 }
 0x30e   : > { %v2520_v54 = vpop.f32.mrb[13].mxu0  ;;  %v2525_v55 = vpop.f32.mrb[13].mxu1  ;;  %v1530_v56 = vsel %vm1529_vm3, %v1297_v52, -inf  ;;  %v1533_v57 = vsel %vm1529_vm3, %v1373_v53, -inf }
 0x30f   : > { %1531 = vmax.xlane.f32.xlu1 %v1530_v56 }
 0x313   : > { %1534 = vmax.xlane.f32.xlu1 %v1533_v57 }
 0x315   : > { %v1449_v58 = vpop.f32.mrb[14].mxu0  ;;  %v1525_v59 = vpop.f32.mrb[14].mxu1 }
 0x316   : > { %v2530_v60 = vpop.f32.mrb[15].mxu0  ;;  %v2535_v61 = vpop.f32.mrb[15].mxu1  ;;  %v1539_v62 = vsel %vm1529_vm3, %v1525_v59, -inf  ;;  %v1536_v63 = vsel %vm1529_vm3, %v1449_v58, -inf }
 0x317   : > { %1540 = vmax.xlane.f32.xlu1 %v1539_v62  ;;  %1537 = vmax.xlane.f32.xlu0 %v1536_v63 }
 0x39c   : > { %v1532_v0 = vpop.xlane.xlu1 %1531 }
 0x39d   : > { %v1542_v1 = vsub.f32 %v1297_v52, %v1532_v0 }
 0x39f   : > { %v1546_v2 = vmul.f32 1.442695, %v1542_v1 }
 0x3a0   : > { %v1535_v3 = vpop.xlane.xlu1 %1534 }
 0x3a1   : > { %2712 = vpow2.f32 %v1546_v2  ;;  %v1543_v4 = vsub.f32 %v1373_v53, %v1535_v3  ;;  %v2291_v2 = vld [vmem:[%s3266_s7] ss:$0 sm:$0xff] }
 0x3a3   : > { %v1548_v5 = vmul.f32 1.442695, %v1543_v4 }
 0x3a4   : > { %v1541_v6 = vpop.xlane.xlu1 %1540  ;;  %v1538_v7 = vpop.xlane.xlu0 %1537 }
 0x3a5   : > { %2714 = vpow2.f32 %v1548_v5  ;;  %v1545_v8 = vsub.f32 %v1525_v59, %v1541_v6  ;;  %v1544_v9 = vsub.f32 %v1449_v58, %v1538_v7 }
 0x3a7   : > { %v1552_v10 = vmul.f32 1.442695, %v1545_v8  ;;  %v1550_v11 = vmul.f32 1.442695, %v1544_v9 }
 0x3a9   : > { %2716 = vpow2.f32 %v1552_v10 }
 0x3aa   : > { %2718 = vpow2.f32 %v1550_v11 }
 0x3ab   : > { %v2713_v13 = vpop.eup %2712 }
 0x3ac   : > { %2539 = vmatmul.mubr.msk.f32.vlgmr.msra.gmra.mrb[16].mxu0 %vm1529_vm3, %v2713_v13  ;;  %v1554_v14 = vsel %vm1529_vm3, %v2713_v13, 0.0 }
 0x3ad   : > { %2547 = vmatpush3.msra.mxu0 %v1150_v48  ;;  %1555 = vadd.xlane.f32.xlu0 %v1554_v14 }
 0x3ae   : > { %2548 = vmatprep.mubr.msk.f32.mxu0 %vm2793_vm1, %v2794_v20  ;;  %2656 = vmatprep.subr.bf16.mxu0 %v2792_v12 }
 0x3af   : > { %v2715_v15 = vpop.eup %2714 }
 0x3b0   : > { %2544 = vmatmul.mubr.msk.f32.vlgmr.msra.gmra.mrb[16].mxu1 %vm1529_vm3, %v2715_v15  ;;  %v1557_v16 = vsel %vm1529_vm3, %v2715_v15, 0.0 }
 0x3b1   : > { %2552 = vmatpush3.msra.mxu1 %v1220_v49  ;;  %1558 = vadd.xlane.f32.xlu1 %v1557_v16 }
 0x3b2   : > { %2553 = vmatprep.mubr.msk.f32.mxu1 %vm2793_vm1, %v2794_v20  ;;  %2659 = vmatprep.subr.bf16.mxu1 %v2792_v12 }
 0x3b3   : > { %v2717_v17 = vpop.eup %2716 }
 0x3b4   : > { %v2719_v18 = vpop.eup %2718  ;;  %2554 = vmatmul.mubr.msk.f32.vlgmr.msra.gmra.mrb[18].mxu1 %vm1529_vm3, %v2717_v17  ;;  %v1563_v19 = vsel %vm1529_vm3, %v2717_v17, 0.0 }
 0x3b5   : > { %2549 = vmatmul.mubr.msk.f32.vlgmr.msra.gmra.mrb[18].mxu0 %vm1529_vm3, %v2719_v18  ;;  %1564 = vadd.xlane.f32.xlu1 %v1563_v19  ;;  %v1560_v21 = vsel %vm1529_vm3, %v2719_v18, 0.0 }
 0x3b6   : > { %1561 = vadd.xlane.f32.xlu0 %v1560_v21  ;;  %2560 = vmatprep.mubr.msk.f32.mxu0 %vm2793_vm1, %v2794_v20 }
 0x3b7   : > { %2567 = vmatprep.mubr.msk.f32.mxu1 %vm2793_vm1, %v2794_v20  ;;  %2658 = vmatpush3.bf16.msra.mxu0 %v2657_v24 }
 0x3b8   : > { %2662 = vmatprep.subr.bf16.mxu0 %v2792_v12  ;;  %2661 = vmatpush3.bf16.msra.mxu1 %v2660_v27 }
 0x3b9   : > { %2665 = vmatprep.subr.bf16.mxu1 %v2792_v12 }
 0x43a   : > { %v1556_v28 = vpop.xlane.xlu0 %1555 }
 0x43b   : > { %2720 = vrcp.f32 %v1556_v28 }
 0x43e   : > { %v1559_v29 = vpop.xlane.xlu1 %1558 }
 0x43f   : > { %2722 = vrcp.f32 %v1559_v29 }
 0x442   : > { %v1565_v30 = vpop.xlane.xlu1 %1564 }
 0x443   : > { %v1562_v31 = vpop.xlane.xlu0 %1561  ;;  %2724 = vrcp.f32 %v1565_v30 }
 0x444   : > { %2726 = vrcp.f32 %v1562_v31 }
 0x445   : > { %v2721_v34 = vpop.eup %2720 }
 0x449   : > { %v2723_v36 = vpop.eup %2722 }
 0x44d   : > { %v2725_v45 = vpop.eup %2724 }
 0x44e   : > { %v2727_v47 = vpop.eup %2726 }
 0x47f   : > { %v1635_v35 = vpop.f32.mrb[16].mxu0 }
 0x480   : > { %v1862_v12 = vmul.f32 %v2721_v34, %v1635_v35  ;;  %v2540_v38 = vpop.f32.mrb[17].mxu0 }
 0x482   : > { %2561 = vmatmul.mubr.msk.f32.vlgmr.msra.gmra.mrb[20].mxu0 %vm1224_vm2, %v1862_v12 }
 0x483   : > { %v1708_v41 = vpop.f32.mrb[16].mxu1  ;;  %2664 = vmatpush3.bf16.msra.mxu0 %v2663_v37  ;;  %2574 = vmatprep.mubr.msk.f32.mxu0 %vm2793_vm1, %v2794_v20 }
 0x484   : > { %v1863_v43 = vmul.f32 %v2723_v36, %v1708_v41  ;;  %v2545_v44 = vpop.f32.mrb[17].mxu1 }
 0x486   : > { %2568 = vmatmul.mubr.msk.f32.vlgmr.msra.gmra.mrb[20].mxu1 %vm1224_vm2, %v1863_v43 }
 0x487   : > { %v1854_v46 = vpop.f32.mrb[18].mxu1  ;;  %2667 = vmatpush3.bf16.msra.mxu1 %v2666_v42  ;;  %2581 = vmatprep.mubr.msk.f32.mxu1 %vm2793_vm1, %v2794_v20 }
 0x488   : > { %v1781_v48 = vpop.f32.mrb[18].mxu0  ;;  %v1865_v49 = vmul.f32 %v2725_v45, %v1854_v46  ;;  %v2555_v50 = vpop.f32.mrb[19].mxu1 }
 0x489   : > { %v1864_v51 = vmul.f32 %v2727_v47, %v1781_v48  ;;  %v2550_v52 = vpop.f32.mrb[19].mxu0 }
 0x48a   : > { %2582 = vmatmul.mubr.msk.f32.vlgmr.msra.gmra.mrb[22].mxu1 %vm1224_vm2, %v1865_v49 }
 0x48b   : > { %2575 = vmatmul.mubr.msk.f32.vlgmr.msra.gmra.mrb[22].mxu0 %vm1224_vm2, %v1864_v51 }
 0x555   : > { %v1943_v53 = vpop.f32.mrb[20].mxu0 }
 0x556   : > { %v2562_v54 = vpop.f32.mrb[21].mxu0  ;;  %v2166_v56 = vsel %vm304_vm0, %v1943_v53, 0.0 }
 0x559   : > { %v2016_v55 = vpop.f32.mrb[20].mxu1 }
 0x55a   : > { %v2167_v57 = vsel %vm304_vm0, %v2016_v55, 0.0  ;;  %v2569_v20 = vpop.f32.mrb[21].mxu1 }
 0x55b   : > { %v2168_v58 = vadd.f32 %v2167_v57, %v2166_v56 }
 0x55d   : > { %v2162_v59 = vpop.f32.mrb[22].mxu1 }
 0x55e   : > { %v2089_v60 = vpop.f32.mrb[22].mxu0  ;;  %v2583_v61 = vpop.f32.mrb[23].mxu1  ;;  %v2171_v1 = vsel %vm304_vm0, %v2162_v59, 0.0 }
 0x55f   : > { %v2169_v62 = vsel %vm304_vm0, %v2089_v60, 0.0  ;;  %v2576_v63 = vpop.f32.mrb[23].mxu0 }
 0x560   : > { %v2170_v0 = vadd.f32 %v2169_v62, %v2168_v58 }
 0x562   : > { %v2172_v3 = vadd.f32 %v2171_v1, %v2170_v0 }
 0x564   : > { %v2180_v4 = vadd.f32 %v2291_v2, %v2172_v3 }
 0x566   : > { %2181 = vst.msk [vmem:[%s296_s26] sm:$0xff] %vm304_vm0, %v2180_v4 }
 0x567   : > { %2741 = shalt.err (!%p2738_p3)
}
 0x568   : > { %s2742_s21 = scalar_lea.hbm %s3216_s17, 128  ;;  %s2746_s25 = scalar_lea.hbm %s3267_s8, 256 }
 0x569   : > { %p2743_p4 = scmp.ne.s32.totalorder %s3216_s17, %s2742_s21  ;;  %p2747_p9 = scmp.lt.u32.totalorder %s3216_s17, %s3267_s8 }
 0x56a   : > { %p2748_p10 = scmp.lt.u32.totalorder %s2746_s25, %s2742_s21  ;;  %p2750_p12 = scmp.lt.u32.totalorder %s2742_s21, %s3216_s17 }
 0x56b   : > { %p2744_p7 = pnand %p2743_p4, %p2879_p5 }
 0x56c   : > { %p2749_p11 = por %p2748_p10, %p2747_p9 }
 0x56d   : > { %p2745_p8 = pneg %p2744_p7 }
 0x56e   : > { %p2751_p13 = por %p2750_p12, %p2749_p11 }
 0x570   : > { %p2752_p0 = pnand %p2751_p13, %p2745_p8 }
 0x572   : > { %2755 = shalt.err (!%p2752_p0)
}
 0x573   : > { %2668 = dma.vmem_to_hbm [thread:$0]  (%p2879_p5), %s3218_s10, 128, %s3216_s17, %s2183_s18  }
 0x574 PF: > { %p2674_p1 = scmp.ge.s32.totalorder %s2790_s30, 2  ;;  %s2208_s13 = sand.u32 1, %s2778_s27  }
 0x575   : > { %s2209_s19 = scalar_lea.sflag [#allocation3], %s2208_s13 }
 0x576   : > { %p2671_p2 = pnand %p2674_p1, %p2883_p6 }
 0x578   : > { %2773 = dma.done.wait (!%p2671_p2), %s2209_s19, 128  }
 0x579   : > { %2775 = vsyncadd (!%p2671_p2), %s2209_s19, 4294967168  ;;  %p18_p3 = scmp.ge.s32.totalorder %s2866_s11, 4   ;;  %s3270_s27 = smov %s2782_s28 }
 0x57a   : > { %s3271_s28 = smov %s2786_s29  ;;  %s3272_s29 = smov %s2877_s14 }
 0x57b   : > { %s3273_s30 = smov %s2866_s11  ;;  %20 = sbr.rel (!%p18_p3) target bundleno = 3 (0x3), region = 87 }
 0x582   :  { %2214 = vsyncpa [#allocation3], 1 }
 0x583   :  { %2216 = vsyncpa [#allocation3 + $0x1], 1 }

</bundles_post_ra>
